<compile_context>
chip_gen: v5e
topology: v5e:2x2
jax: 0.10.0
libtpu: 0.0.40
codegen_flags: <defaults>
</compile_context>

<pallas_src>
import jax
import jax.numpy as jnp
from jax.experimental import pallas as pl
from jax.experimental.pallas import tpu as pltpu


def _round_up(x, m):
    return ((x + m - 1) // m) * m


def _cdiv(a, b):
    return (a + b - 1) // b


def _pad2d(a, rows, cols):
    r, c = a.shape
    if r == rows and c == cols:
        return a
    return jnp.pad(a, ((0, rows - r), (0, cols - c)))


# Raised scoped-VMEM limit (defaults: 16 MiB v5e / 32 MiB v6e,v7x); stays under
# v7x's 64 MiB physical with headroom.
_VMEM_LIMIT = 48 * 1024 * 1024
# What we allow our resident weights + tiles to consume.
_VMEM_BUDGET = 40 * 1024 * 1024

# Probe for BlockSpec(pipeline_mode=...) support (single-buffer constant operands).
try:
    pl.BlockSpec((8, 128), lambda i: (0, 0), pipeline_mode=pl.Buffered(1))
    _HAVE_BUFFERED = True
except Exception:  # pragma: no cover - older JAX without pipeline_mode
    _HAVE_BUFFERED = False
_WEIGHT_BUFFERS = 1 if _HAVE_BUFFERED else 2


def _const_spec(shape):
    """BlockSpec for an operand whose block never changes across the grid.

    Single-buffered so constant weights/biases are not double-buffered
    (saves VMEM); index_map is constant (0, ..., 0).
    """
    idx = lambda *args: (0,) * len(shape)
    if _HAVE_BUFFERED:
        return pl.BlockSpec(shape, idx, pipeline_mode=pl.Buffered(1))
    return pl.BlockSpec(shape, idx)


# ----------------------------------------------------------------------------
# Fused two-layer kernel: both weight matrices resident in VMEM, grid over batch.
# ----------------------------------------------------------------------------
def _fused_kernel(x_ref, w1t_ref, b1_ref, w2t_ref, b2_ref, o_ref):
    # x_ref: (tm, Fp); w1t_ref: (Fp, Hp); b1_ref: (1, Hp)
    # w2t_ref: (Hp, Np); b2_ref: (1, Np); o_ref: (tm, Np)
    # Weights are already in [in, out] layout -> plain NN dots, no XLU transpose.
    h = jnp.dot(x_ref[...], w1t_ref[...], preferred_element_type=jnp.float32)
    h = h + b1_ref[...]                       # bias add stays f32 (v5e VPU has no bf16)
    h = h.astype(w2t_ref.dtype)               # feed the MXU in the weight dtype
    out = jnp.dot(h, w2t_ref[...], preferred_element_type=jnp.float32)
    o_ref[...] = (out + b2_ref[...]).astype(o_ref.dtype)


def _fused_forward(xp, w1t, b1, w2t, b2, *, tm, out_dtype=jnp.float32):
    Bp, Fp = xp.shape
    _, Hp = w1t.shape
    _, Np = w2t.shape
    grid = (_cdiv(Bp, tm),)  # partial last tile OK: rows are independent

    wbytes = w1t.dtype.itemsize
    cost = pl.CostEstimate(
        flops=2 * Bp * Hp * Fp + 2 * Bp * Np * Hp,
        transcendentals=0,
        bytes_accessed=(Bp * Fp * xp.dtype.itemsize
                        + (Fp * Hp + Hp * Np) * wbytes
                        + (Hp + Np) * 4
                        + Bp * Np * 4),
    )

    return pl.pallas_call(
        _fused_kernel,
        out_shape=jax.ShapeDtypeStruct((Bp, Np), out_dtype),
        grid=grid,
        in_specs=[
            pl.BlockSpec((tm, Fp), lambda i: (i, 0)),   # x: tiled over batch
            _const_spec((Fp, Hp)),                      # W1^T: resident, 1 buffer
            _const_spec((1, Hp)),                       # b1
            _const_spec((Hp, Np)),                      # W2^T
            _const_spec((1, Np)),                       # b2
        ],
        out_specs=pl.BlockSpec((tm, Np), lambda i: (i, 0)),
        compiler_params=pltpu.CompilerParams(
            # Batch axis is independent -> shard grid steps across v7x's 2 TCs.
            dimension_semantics=("parallel",),
            vmem_limit_bytes=_VMEM_LIMIT,
        ),
        cost_estimate=cost,
    )(xp, w1t, b1, w2t, b2)


# ----------------------------------------------------------------------------
# Fallback: single linear layer as a K-tiled matmul with an f32 accumulator,
# for layers whose weights cannot stay fully resident in VMEM (e.g. v7x 64 MiB).
# ----------------------------------------------------------------------------
def _linear_kernel(x_ref, wt_ref, b_ref, o_ref, acc_ref):
    @pl.when(pl.program_id(2) == 0)
    def _():
        acc_ref[...] = jnp.zeros_like(acc_ref)

    acc_ref[...] += jnp.dot(x_ref[...], wt_ref[...],
                            preferred_element_type=jnp.float32)

    @pl.when(pl.program_id(2) == pl.num_programs(2) - 1)
    def _():
        o_ref[...] = (acc_ref[...] + b_ref[...]).astype(o_ref.dtype)


def _pick_tile(dim, cands=(512, 256, 128)):
    for c in cands:
        if dim % c == 0:
            return c
    return dim  # padded dims are always multiples of 128


def _linear_forward(xp, wt, b, *, tm, out_dtype=jnp.float32):
    Bp, Kp = xp.shape
    Kp2, Np_ = wt.shape
    assert Kp == Kp2
    tn = _pick_tile(Np_)
    tk = _pick_tile(Kp)
    grid = (_cdiv(Bp, tm), Np_ // tn, Kp // tk)

    cost = pl.CostEstimate(
        flops=2 * Bp * Np_ * Kp,
        transcendentals=0,
        bytes_accessed=(Bp * Kp * xp.dtype.itemsize
                        + Kp * Np_ * wt.dtype.itemsize
                        + Np_ * 4 + Bp * Np_ * 4),
    )

    return pl.pallas_call(
        _linear_kernel,
        out_shape=jax.ShapeDtypeStruct((Bp, Np_), out_dtype),
        grid=grid,
        in_specs=[
            pl.BlockSpec((tm, tk), lambda i, j, k: (i, k)),
            pl.BlockSpec((tk, tn), lambda i, j, k: (k, j)),
            pl.BlockSpec((1, tn), lambda i, j, k: (0, j)),
        ],
        out_specs=pl.BlockSpec((tm, tn), lambda i, j, k: (i, j)),
        scratch_shapes=[pltpu.VMEM((tm, tn), jnp.float32)],
        compiler_params=pltpu.CompilerParams(
            dimension_semantics=("parallel", "parallel", "arbitrary"),
            vmem_limit_bytes=_VMEM_LIMIT,
        ),
        cost_estimate=cost,
    )(xp, wt, b)


# ----------------------------------------------------------------------------
# Module wrapper
# ----------------------------------------------------------------------------
def kaiming_uniform(key, shape):
    # torch.nn.init.kaiming_uniform (a=0, fan_in mode): bound = sqrt(6 / fan_in)
    fan_in = shape[1]
    bound = jnp.sqrt(6.0 / fan_in)
    return jax.random.uniform(key, shape, jnp.float32, -bound, bound)


class LinearFeedbackAlignmentPallas:
    def __init__(self, in_features, num_layers, num_hidden_list, key,
                 compute_dtype=jnp.float32, tm=512, force_layered=False):
        assert num_layers == len(num_hidden_list)
        # The torch forward uses exactly the first two layers.
        assert num_layers >= 2, "forward requires at least two layers"
        self.compute_dtype = compute_dtype
        self.tm = tm
        self._force_layered = force_layered

        # Raw parameters in torch layout ([out, in]), f32 — kept for reference.
        self.weights, self.biases = [], []
        dims = [in_features] + list(num_hidden_list)
        keys = jax.random.split(key, num_layers)
        for i in range(num_layers):
            w = kaiming_uniform(keys[i], (dims[i + 1], dims[i]))
            b = jnp.ones((dims[i + 1],), jnp.float32)  # init.constant(bias, 1)
            # weight_fa is backward-only; omitted in this forward-only kernel.
            self.weights.append(w)
            self.biases.append(b)

        # --- cached, padded, [in, out]-layout, compute-dtype copies (hoisted
        # out of the per-call path): no per-call pad/transpose HBM traffic.
        F, H, N = in_features, num_hidden_list[0], num_hidden_list[1]
        self._F, self._H, self._N = F, H, N
        Fp, Hp, Np = (_round_up(d, 128) for d in (F, H, N))
        self._Fp, self._Hp, self._Np = Fp, Hp, Np
        self._w1t = _pad2d(self.weights[0].T, Fp, Hp).astype(compute_dtype)
        self._w2t = _pad2d(self.weights[1].T, Hp, Np).astype(compute_dtype)
        self._b1 = _pad2d(self.biases[0].reshape(1, H), 1, Hp).astype(jnp.float32)
        self._b2 = _pad2d(self.biases[1].reshape(1, N), 1, Np).astype(jnp.float32)

    def __call__(self, x):
        B, F = x.shape
        assert F == self._F
        Fp, Hp, Np = self._Fp, self._Hp, self._Np

        # Batch padded only to a sublane multiple; partial last grid tile is OK.
        Bp = _round_up(B, 8)
        xp = _pad2d(x, Bp, Fp).astype(self.compute_dtype)

        tm = _round_up(min(self.tm, Bp), 8)
        if Bp >= 16 and _cdiv(Bp, tm) < 2:
            # >=2 grid steps so the "parallel" batch axis can use both v7x TCs.
            tm = _round_up(_cdiv(Bp, 2), 8)

        wbytes = jnp.dtype(self.compute_dtype).itemsize
        resident_w = _WEIGHT_BUFFERS * ((Fp * Hp + Hp * Np) * wbytes
                                        + (Hp + Np) * 4)

        def _fused_vmem(t):
            return (resident_w
                    + 2 * t * Fp * wbytes   # x tile, double-buffered
                    + 2 * t * Np * 4        # out tile, double-buffered (f32)
                    + t * Hp * 4)           # intermediate h

        while tm > 8 and _fused_vmem(tm) > _VMEM_BUDGET:
            tm = _round_up(max(8, tm // 2), 8)

        if (not self._force_layered) and _fused_vmem(tm) <= _VMEM_BUDGET:
            out_p = _fused_forward(xp, self._w1t, self._b1,
                                   self._w2t, self._b2, tm=tm)
        else:
            # Weights too large to keep resident (halves first on v7x's 64 MiB
            # VMEM): per-layer K-tiled matmul with an f32 VMEM accumulator.
            lt = min(512, _round_up(Bp, 8))
            h = _linear_forward(xp, self._w1t, self._b1, tm=lt)
            h = h.astype(self.compute_dtype)
            out_p = _linear_forward(h, self._w2t, self._b2, tm=lt)

        return out_p[:B, :self._N]


if __name__ == "__main__":
    key = jax.random.PRNGKey(0)
    k_x, k_params = jax.random.split(key)

    batch = 8
    in_features = 32
    num_hidden_list = [64, 16]
    num_layers = 2

    x = jax.random.normal(k_x, (batch, in_features), jnp.float32)

    # f32 fused path: exact vs. reference.
    model = LinearFeedbackAlignmentPallas(
        in_features, num_layers, num_hidden_list, k_params,
        compute_dtype=jnp.float32)
    out = jax.block_until_ready(model(x))

    ref = x @ model.weights[0].T + model.biases[0][None, :]
    ref = ref @ model.weights[1].T + model.biases[1][None, :]
    assert out.shape == (batch, num_hidden_list[1])
    assert jnp.allclose(out, ref, atol=1e-5, rtol=1e-5)

    # Layered (K-tiled accumulator) fallback path: same f32 math, exact check.
    model_layered = LinearFeedbackAlignmentPallas(
        in_features, num_layers, num_hidden_list, k_params,
        compute_dtype=jnp.float32, force_layered=True)
    out_layered = jax.block_until_ready(model_layered(x))
    assert jnp.allclose(out_layered, ref, atol=1e-5, rtol=1e-5)

    # bf16-weight path (MXU-friendly on v5e/v6e/v7x): f32 accumulation, loose tol.
    model_bf16 = LinearFeedbackAlignmentPallas(
        in_features, num_layers, num_hidden_list, k_params,
        compute_dtype=jnp.bfloat16)
    out_bf16 = jax.block_until_ready(model_bf16(x))
    assert jnp.allclose(out_bf16, ref, atol=2.5e-1, rtol=5e-2)

    print("KERNEL_OK")
</pallas_src>

<mosaic_0001>
module attributes {stable_mosaic.version = 11 : i64} {
  func.func @_fused_kernel(%arg0: i32, %arg1: memref<8x128xf32, #tpu.memory_space<vmem>>, %arg2: memref<128x128xf32, #tpu.memory_space<vmem>>, %arg3: memref<1x128xf32, #tpu.memory_space<vmem>>, %arg4: memref<128x128xf32, #tpu.memory_space<vmem>>, %arg5: memref<1x128xf32, #tpu.memory_space<vmem>>, %arg6: memref<8x128xf32, #tpu.memory_space<vmem>>) attributes {dimension_semantics = [#tpu.dimension_semantics<parallel>], iteration_bounds = array<i64: 1>, scalar_prefetch = 0 : i64, scratch_operands = 0 : i64, tpu.core_type = #tpu.core_type<tc>, window_params = [{transform_indices = @transform_0, window_bounds = array<i64: 8, 128>}, {pipeline_mode = #tpu.pipeline_mode<synchronous>, transform_indices = @transform_1, window_bounds = array<i64: 128, 128>}, {pipeline_mode = #tpu.pipeline_mode<synchronous>, transform_indices = @transform_2, window_bounds = array<i64: 1, 128>}, {pipeline_mode = #tpu.pipeline_mode<synchronous>, transform_indices = @transform_3, window_bounds = array<i64: 128, 128>}, {pipeline_mode = #tpu.pipeline_mode<synchronous>, transform_indices = @transform_4, window_bounds = array<i64: 1, 128>}, {transform_indices = @transform_5, window_bounds = array<i64: 8, 128>}]} {
    %c0 = arith.constant 0 : index
    %c0_0 = arith.constant 0 : index
    %0 = vector.load %arg1[%c0, %c0_0] : memref<8x128xf32, #tpu.memory_space<vmem>>, vector<8x128xf32>
    %c0_1 = arith.constant 0 : index
    %c0_2 = arith.constant 0 : index
    %1 = vector.load %arg2[%c0_1, %c0_2] : memref<128x128xf32, #tpu.memory_space<vmem>>, vector<128x128xf32>
    %cst = arith.constant dense<0.000000e+00> : vector<8x128xf32>
    %2 = tpu.matmul %0, %1, %cst {dimension_numbers = #tpu.dot_dimension_numbers<[1], [0], [0], [1], [0, 0, 1, 1], [], []>} : vector<8x128xf32>, vector<128x128xf32>, vector<8x128xf32> -> vector<8x128xf32>
    %c0_3 = arith.constant 0 : index
    %c0_4 = arith.constant 0 : index
    %3 = vector.load %arg3[%c0_3, %c0_4] : memref<1x128xf32, #tpu.memory_space<vmem>>, vector<1x128xf32>
    %4 = vector.broadcast %3 : vector<1x128xf32> to vector<8x128xf32>
    %5 = arith.addf %2, %4 : vector<8x128xf32>
    %c0_5 = arith.constant 0 : index
    %c0_6 = arith.constant 0 : index
    %6 = vector.load %arg4[%c0_5, %c0_6] : memref<128x128xf32, #tpu.memory_space<vmem>>, vector<128x128xf32>
    %cst_7 = arith.constant dense<0.000000e+00> : vector<8x128xf32>
    %7 = tpu.matmul %5, %6, %cst_7 {dimension_numbers = #tpu.dot_dimension_numbers<[1], [0], [0], [1], [0, 0, 1, 1], [], []>} : vector<8x128xf32>, vector<128x128xf32>, vector<8x128xf32> -> vector<8x128xf32>
    %c0_8 = arith.constant 0 : index
    %c0_9 = arith.constant 0 : index
    %8 = vector.load %arg5[%c0_8, %c0_9] : memref<1x128xf32, #tpu.memory_space<vmem>>, vector<1x128xf32>
    %9 = vector.broadcast %8 : vector<1x128xf32> to vector<8x128xf32>
    %10 = arith.addf %7, %9 : vector<8x128xf32>
    %c0_10 = arith.constant 0 : index
    %c0_11 = arith.constant 0 : index
    %11 = vector.load %arg6[%c0_10, %c0_11] : memref<8x128xf32, #tpu.memory_space<vmem>>, vector<8x128xf32>
    tpu.vector_store %arg6[%c0_10, %c0_11], %10 {strides = array<i32>} : memref<8x128xf32, #tpu.memory_space<vmem>>, vector<8x128xf32>,
    return
  }
  func.func @transform_0(%arg0: i32) -> (i32, i32) {
    %c0_i32 = arith.constant 0 : i32
    %c0_i32_0 = arith.constant 0 : i32
    return %arg0, %c0_i32 : i32, i32
  }
  func.func @transform_1(%arg0: i32) -> (i32, i32) {
    %c0_i32 = arith.constant 0 : i32
    %c0_i32_0 = arith.constant 0 : i32
    %c0_i32_1 = arith.constant 0 : i32
    return %c0_i32, %c0_i32_0 : i32, i32
  }
  func.func @transform_2(%arg0: i32) -> (i32, i32) {
    %c0_i32 = arith.constant 0 : i32
    %c0_i32_0 = arith.constant 0 : i32
    %c0_i32_1 = arith.constant 0 : i32
    return %c0_i32, %c0_i32_0 : i32, i32
  }
  func.func @transform_3(%arg0: i32) -> (i32, i32) {
    %c0_i32 = arith.constant 0 : i32
    %c0_i32_0 = arith.constant 0 : i32
    %c0_i32_1 = arith.constant 0 : i32
    return %c0_i32, %c0_i32_0 : i32, i32
  }
  func.func @transform_4(%arg0: i32) -> (i32, i32) {
    %c0_i32 = arith.constant 0 : i32
    %c0_i32_0 = arith.constant 0 : i32
    %c0_i32_1 = arith.constant 0 : i32
    return %c0_i32, %c0_i32_0 : i32, i32
  }
  func.func @transform_5(%arg0: i32) -> (i32, i32) {
    %c0_i32 = arith.constant 0 : i32
    %c0_i32_0 = arith.constant 0 : i32
    return %arg0, %c0_i32 : i32, i32
  }
}

</mosaic_0001>

<bundles_post_ra>
// kernel: tpu_custom_call.1
= control target key start
LH: loop header
LB: loop body
LE: loop exit
PB: predicated region body
PF: predicated region fallthrough
CT: control target
= control target key end

     0   :  { %10 = vsyncpa [#allocation3], 0  ;;  %s330_s0 = inlined_call_operand.hbm [shape: f32[8,128], index: 0, kind: input, shape index: {}]   ;;  %s331_s1 = inlined_call_operand.hbm [shape: f32[128,128], index: 1, kind: input, shape index: {}]   ;;  %s332_s2 = inlined_call_operand.vmem [shape: f32[1,128], index: 2, kind: input, shape index: {}]   ;;  %s333_s3 = inlined_call_operand.hbm [shape: f32[128,128], index: 3, kind: input, shape index: {}]   ;;  %s334_s4 = inlined_call_operand.vmem [shape: f32[1,128], index: 4, kind: input, shape index: {}]   ;;  %s335_s5 = inlined_call_operand.hbm [shape: f32[8,128], index: 5, kind: output, shape index: {}]  }
   0x1   :  { %11 = vsyncpa [#allocation6], 0  ;;  %s28_s20 = sshll.u32 %s331_s1, 4  ;;  %s29_s20 = int_to_ptr.hbm [resolvable:$true] %s28_s20 }
   0x2   :  { %12 = vsyncpa [#allocation4], 0  ;;  %s276_s21 = smov [#allocation5]   ;;  %s18_s25 = sshll.u32 %s330_s0, 4  ;;  %s19_s25 = int_to_ptr.hbm [resolvable:$true] %s18_s25 }
   0x3   :  { %s30_s22 = sshll.u32 %s276_s21, 4  ;;  %s277_s26 = smov 128   ;;  %s31_s22 = int_to_ptr.vmem [resolvable:$true] %s30_s22 }
   0x4   :  { %s278_s27 = smov 8   ;;  %s279_s28 = smov [#allocation2]  }
   0x5   :  { %36 = dma.hbm_to_vmem [thread:$0]  %s29_s20, 2048, %s31_s22, [#allocation6], %s277_s26, %s277_s26, %s278_s27  }
   0x6   :  { %s20_s29 = sshll.u32 %s279_s28, 4  ;;  %s43_s7 = sshll.u32 %s333_s3, 4  ;;  %s21_s29 = int_to_ptr.vmem [resolvable:$true] %s20_s29  ;;  %s44_s7 = int_to_ptr.hbm [resolvable:$true] %s43_s7 }
   0x7   :  { %23 = dma.hbm_to_vmem [thread:$0]  %s19_s25, 128, %s21_s29, [#allocation3]  }
   0x8   :  { %s280_s1 = smov [#allocation7]  }
   0x9   :  { %s45_s8 = sshll.u32 %s280_s1, 4  ;;  %s46_s8 = int_to_ptr.vmem [resolvable:$true] %s45_s8 }
   0xa   :  { %51 = dma.hbm_to_vmem [thread:$0]  %s44_s7, 2048, %s46_s8, [#allocation6], %s277_s26, %s277_s26, %s278_s27  }
   0xb   :  { %270 = dma.done.wait [#allocation3], 128  }
   0xc   :  { %271 = vsyncadd [#allocation3], 4294967168 }
   0xd   :  { %272 = dma.done.wait [#allocation6], 4096  }
   0xe   :  { %273 = vsyncadd [#allocation6], 4294963200  ;;  %v82_v0 = vld [vmem:[#allocation5 + $0x78] sm:$0xff]  ;;  %v81_v1 = vld [vmem:[#allocation5 + $0x70] sm:$0xff]  ;;  %s281_s11 = smov [#allocation8]   ;;  %s155_s15 = sshll.u32 %s335_s5, 4  ;;  %s156_s15 = int_to_ptr.hbm [resolvable:$true] %s155_s15 }
   0xf   :  { %87 = vmatpush.msra.mxu0 %v82_v0  ;;  %v80_v2 = vld [vmem:[#allocation5 + $0x68] sm:$0xff]  ;;  %v79_v3 = vld [vmem:[#allocation5 + $0x60] sm:$0xff]  ;;  %v122_v4 = vld [vmem:[#allocation7 + $0x78] sm:$0xff]  ;;  %s153_s12 = sshll.u32 %s281_s11, 4  ;;  %s154_s12 = int_to_ptr.vmem [resolvable:$true] %s153_s12 }
  0x10   :  { %v78_v5 = vld [vmem:[#allocation5 + $0x58] sm:$0xff]  ;;  %127 = vmatpush.msra.mxu1 %v122_v4  ;;  %v121_v6 = vld [vmem:[#allocation7 + $0x70] sm:$0xff]  ;;  %v120_v7 = vld [vmem:[#allocation7 + $0x68] sm:$0xff] }
  0x11   :  { %88 = vmatpush.msra.mxu0 %v81_v1  ;;  %v77_v8 = vld [vmem:[#allocation5 + $0x50] sm:$0xff]  ;;  %v119_v9 = vld [vmem:[#allocation7 + $0x60] sm:$0xff]  ;;  %v76_v10 = vld [vmem:[#allocation5 + $0x48] sm:$0xff] }
  0x12   :  { %128 = vmatpush.msra.mxu1 %v121_v6  ;;  %v118_v11 = vld [vmem:[#allocation7 + $0x58] sm:$0xff]  ;;  %v75_v12 = vld [vmem:[#allocation5 + $0x40] sm:$0xff]  ;;  %v117_v13 = vld [vmem:[#allocation7 + $0x50] sm:$0xff] }
  0x13   :  { %89 = vmatpush.msra.mxu0 %v80_v2  ;;  %v74_v14 = vld [vmem:[#allocation5 + $0x38] sm:$0xff]  ;;  %v116_v15 = vld [vmem:[#allocation7 + $0x48] sm:$0xff]  ;;  %v73_v16 = vld [vmem:[#allocation5 + $0x30] sm:$0xff] }
  0x14   :  { %129 = vmatpush.msra.mxu1 %v120_v7  ;;  %v115_v17 = vld [vmem:[#allocation7 + $0x40] sm:$0xff]  ;;  %v72_v18 = vld [vmem:[#allocation5 + $0x28] sm:$0xff]  ;;  %v114_v19 = vld [vmem:[#allocation7 + $0x38] sm:$0xff] }
  0x15   :  { %90 = vmatpush.msra.mxu0 %v79_v3  ;;  %v71_v20 = vld [vmem:[#allocation5 + $0x20] sm:$0xff]  ;;  %v113_v21 = vld [vmem:[#allocation7 + $0x30] sm:$0xff]  ;;  %v70_v22 = vld [vmem:[#allocation5 + $0x18] sm:$0xff] }
  0x16   :  { %130 = vmatpush.msra.mxu1 %v119_v9  ;;  %v112_v23 = vld [vmem:[#allocation7 + $0x28] sm:$0xff]  ;;  %v69_v24 = vld [vmem:[#allocation5 + $0x10] sm:$0xff]  ;;  %v111_v25 = vld [vmem:[#allocation7 + $0x20] sm:$0xff] }
  0x17   :  { %91 = vmatpush.msra.mxu0 %v78_v5  ;;  %v68_v26 = vld [vmem:[#allocation5 + $0x8] sm:$0xff]  ;;  %v110_v27 = vld [vmem:[#allocation7 + $0x18] sm:$0xff]  ;;  %v67_v28 = vld [vmem:[#allocation5] sm:$0xff] }
  0x18   :  { %131 = vmatpush.msra.mxu1 %v118_v11  ;;  %v66_v29 = vld [vmem:[#allocation2] sm:$0xff]  ;;  %v109_v30 = vld [vmem:[#allocation7 + $0x10] sm:$0xff]  ;;  %v108_v31 = vld [vmem:[#allocation7 + $0x8] sm:$0xff] }
  0x19   :  { %92 = vmatpush.msra.mxu0 %v77_v8  ;;  %v107_v32 = vld [vmem:[#allocation7] sm:$0xff]  ;;  %v172_v33 = vld [vmem:[%s332_s2] ss:$0 sm:$0xff] }
  0x1a   :  { %132 = vmatpush.msra.mxu1 %v117_v13  ;;  %v173_v36 = vld [vmem:[%s334_s4] ss:$0 sm:$0xff] }
  0x1b   :  { %93 = vmatpush.msra.mxu0 %v76_v10 }
  0x1c   :  { %133 = vmatpush.msra.mxu1 %v116_v15 }
  0x1d   :  { %94 = vmatpush.msra.mxu0 %v75_v12 }
  0x1e   :  { %134 = vmatpush.msra.mxu1 %v115_v17 }
  0x1f   :  { %95 = vmatpush.msra.mxu0 %v74_v14 }
  0x20   :  { %135 = vmatpush.msra.mxu1 %v114_v19 }
  0x21   :  { %96 = vmatpush.msra.mxu0 %v73_v16 }
  0x22   :  { %136 = vmatpush.msra.mxu1 %v113_v21 }
  0x23   :  { %97 = vmatpush.msra.mxu0 %v72_v18 }
  0x24   :  { %137 = vmatpush.msra.mxu1 %v112_v23 }
  0x25   :  { %98 = vmatpush.msra.mxu0 %v71_v20 }
  0x26   :  { %138 = vmatpush.msra.mxu1 %v111_v25 }
  0x27   :  { %99 = vmatpush.msra.mxu0 %v70_v22 }
  0x28   :  { %139 = vmatpush.msra.mxu1 %v110_v27 }
  0x29   :  { %100 = vmatpush.msra.mxu0 %v69_v24 }
  0x2a   :  { %140 = vmatpush.msra.mxu1 %v109_v30 }
  0x2b   :  { %101 = vmatpush.msra.mxu0 %v68_v26 }
  0x2c   :  { %141 = vmatpush.msra.mxu1 %v108_v31 }
  0x2d   :  { %102 = vmatpush.msra.mxu0 %v67_v28 }
  0x2e   :  { %103 = vmatmul.f32.vlgmr.msra.gmra.mxu0 %v66_v29  ;;  %142 = vmatpush.msra.mxu1 %v107_v32 }
  0xab   :  { %v104_v34 = vpop.f32.mrf.mxu0 }
  0xac   :  { %v105_v35 = vadd.f32 %v172_v33, %v104_v34 }
  0xae   :  { %143 = vmatmul.f32.vlgmr.msra.gmra.mxu1 %v105_v35 }
 0x12b   :  { %v144_v37 = vpop.f32.mrf.mxu1 }
 0x12c   :  { %v145_v38 = vadd.f32 %v173_v36, %v144_v37 }
 0x12e   :  { %147 = vst [vmem:[#allocation8] sm:$0xff] %v145_v38 }
 0x12f   :  { %158 = dma.vmem_to_hbm [thread:$0]  %s154_s12, 128, %s156_s15, [#allocation4]  }
 0x130   :  { %274 = dma.done.wait [#allocation4], 128  }
 0x131   :  { %275 = vsyncadd [#allocation4], 4294967168 }
 0x132   :  { %163 = vsyncpa [#allocation3], 1 }
 0x133   :  { %164 = vsyncpa [#allocation6], 1 }
 0x134   :  { %165 = vsyncpa [#allocation4], 1 }

</bundles_post_ra>
